<compile_context>
chip_gen: v6e
topology: v6e:2x2x1
jax: 0.10.0
libtpu: 0.0.40
codegen_flags: <defaults>
</compile_context>

<pallas_src>
import jax
import jax.numpy as jnp
import numpy as np
from jax.experimental import pallas as pl
from jax.experimental.pallas import tpu as pltpu


def _round_up(x: int, m: int) -> int:
    return ((x + m - 1) // m) * m


def gcn_kernel(adj_ref, feat_ref, wt_ref, b_ref, out_ref, acc_ref):
    """Grid = (dst tiles i, src reduction tiles k); k is the reduction axis."""
    k = pl.program_id(1)

    @pl.when(k == 0)
    def _init():
        acc_ref[...] = jnp.zeros_like(acc_ref)

    # Partial aggregation: acc += A_tile (bf16) @ H_tile (bf16), f32 accumulate.
    acc_ref[...] += jnp.dot(
        adj_ref[...], feat_ref[...], preferred_element_type=jnp.float32
    )

    @pl.when(k == pl.num_programs(1) - 1)
    def _finalize():
        # Linear projection with pre-transposed weight (no in-kernel .T) + bias.
        h = jnp.dot(
            acc_ref[...].astype(wt_ref.dtype),
            wt_ref[...],
            preferred_element_type=jnp.float32,
        )
        out_ref[...] = (h + b_ref[...]).astype(out_ref.dtype)


def gcn_layer(adj, feat, weight, bias, *, tm=128, tk=128):
    """adj: [N, N] (A[dst, src]), feat: [N, in_feats],
    weight: [out_feats, in_feats] (PyTorch nn.Linear layout), bias: [out_feats]."""
    N, in_feats = feat.shape
    out_feats = weight.shape[0]

    # Lane-dense padding: feature / output dims to multiples of 128,
    # node dims to multiples of the tile sizes. Zero padding is exact for
    # sum-aggregation and for the linear layer (padded rows/cols contribute 0).
    f_in_p = _round_up(in_feats, 128)
    f_out_p = _round_up(out_feats, 128)
    n_dst_p = _round_up(N, tm)
    n_src_p = _round_up(N, tk)

    # bf16 operands for the MXU. Adjacency is 0/1 -> bf16 is lossless.
    adj_p = jnp.zeros((n_dst_p, n_src_p), jnp.bfloat16).at[:N, :N].set(
        adj.astype(jnp.bfloat16)
    )
    feat_p = jnp.zeros((n_src_p, f_in_p), jnp.bfloat16).at[:N, :in_feats].set(
        feat.astype(jnp.bfloat16)
    )
    # Pre-transposed weight: [in_feats, out_feats], padded, bf16.
    wt_p = jnp.zeros((f_in_p, f_out_p), jnp.bfloat16).at[:in_feats, :out_feats].set(
        weight.T.astype(jnp.bfloat16)
    )
    bias_p = jnp.zeros((1, f_out_p), jnp.float32).at[0, :out_feats].set(
        bias.astype(jnp.float32)
    )

    grid = (n_dst_p // tm, n_src_p // tk)

    out_p = pl.pallas_call(
        gcn_kernel,
        out_shape=jax.ShapeDtypeStruct((n_dst_p, f_out_p), feat.dtype),
        grid_spec=pltpu.PrefetchScalarGridSpec(
            num_scalar_prefetch=0,
            grid=grid,
            in_specs=[
                pl.BlockSpec((tm, tk), lambda i, k: (i, k)),        # adj tile
                pl.BlockSpec((tk, f_in_p), lambda i, k: (k, 0)),    # feat tile
                pl.BlockSpec((f_in_p, f_out_p), lambda i, k: (0, 0)),  # W^T
                pl.BlockSpec((1, f_out_p), lambda i, k: (0, 0)),    # bias row
            ],
            out_specs=pl.BlockSpec((tm, f_out_p), lambda i, k: (i, 0)),
            scratch_shapes=[pltpu.VMEM((tm, f_in_p), jnp.float32)],
        ),
        compiler_params=pltpu.CompilerParams(
            # dst-tile axis can shard across TensorCores; src axis is a reduction.
            dimension_semantics=("parallel", "arbitrary"),
        ),
    )(adj_p, feat_p, wt_p, bias_p)

    return out_p[:N, :out_feats]


if __name__ == "__main__":
    N_NODES = 8
    IN_FEATS = 16
    OUT_FEATS = 32

    key = jax.random.PRNGKey(0)
    k_feat, k_adj, k_w, k_b = jax.random.split(key, 4)

    # Node features.
    feat = jax.random.normal(k_feat, (N_NODES, IN_FEATS), dtype=jnp.float32)

    # Deterministic random directed graph: A[dst, src] = 1 with p=0.4.
    adj = (jax.random.uniform(k_adj, (N_NODES, N_NODES)) < 0.4).astype(jnp.float32)

    # Deterministic nn.Linear-style parameters (synthetic init, not a checkpoint).
    bound = 1.0 / (IN_FEATS ** 0.5)
    weight = jax.random.uniform(
        k_w, (OUT_FEATS, IN_FEATS), minval=-bound, maxval=bound, dtype=jnp.float32
    )
    bias = jax.random.uniform(
        k_b, (OUT_FEATS,), minval=-bound, maxval=bound, dtype=jnp.float32
    )

    out = gcn_layer(adj, feat, weight, bias)
    out = jax.block_until_ready(out)
    assert out.shape == (N_NODES, OUT_FEATS)

    # Quantization-aware reference (same bf16 operand rounding, f32 accumulate).
    feat_q = feat.astype(jnp.bfloat16).astype(jnp.float32)
    wt_q = weight.T.astype(jnp.bfloat16).astype(jnp.float32)
    agg_q = adj @ feat_q
    ref_q = agg_q.astype(jnp.bfloat16).astype(jnp.float32) @ wt_q + bias
    assert jnp.allclose(out, ref_q, atol=2e-3, rtol=2e-3), "mismatch vs bf16-aware ref"

    # Loose sanity check vs the full-f32 PyTorch-equivalent math.
    ref_f32 = (adj @ feat) @ weight.T + bias
    assert jnp.allclose(out, ref_f32, atol=1e-1, rtol=5e-2), "mismatch vs f32 ref"

    print("KERNEL_OK")
</pallas_src>

<mosaic_0001>
module attributes {stable_mosaic.version = 11 : i64} {
  func.func @gcn_kernel(%arg0: i32, %arg1: i32, %arg2: memref<128x128xbf16, #tpu.memory_space<vmem>>, %arg3: memref<128x128xbf16, #tpu.memory_space<vmem>>, %arg4: memref<128x128xbf16, #tpu.memory_space<vmem>>, %arg5: memref<1x128xf32, #tpu.memory_space<vmem>>, %arg6: memref<128x128xf32, #tpu.memory_space<vmem>>, %arg7: memref<128x128xf32, #tpu.memory_space<vmem>>) attributes {dimension_semantics = [#tpu.dimension_semantics<parallel>, #tpu.dimension_semantics<arbitrary>], iteration_bounds = array<i64: 1, 1>, scalar_prefetch = 0 : i64, scratch_operands = 1 : i64, tpu.core_type = #tpu.core_type<tc>, window_params = [{transform_indices = @transform_0, window_bounds = array<i64: 128, 128>}, {transform_indices = @transform_1, window_bounds = array<i64: 128, 128>}, {pipeline_mode = #tpu.pipeline_mode<synchronous>, transform_indices = @transform_2, window_bounds = array<i64: 128, 128>}, {pipeline_mode = #tpu.pipeline_mode<synchronous>, transform_indices = @transform_3, window_bounds = array<i64: 1, 128>}, {transform_indices = @transform_4, window_bounds = array<i64: 128, 128>}]} {
    %c0_i32 = arith.constant 0 : i32
    %0 = arith.cmpi eq, %arg1, %c0_i32 : i32
    %1 = arith.extui %0 : i1 to i32
    %c0_i32_0 = arith.constant 0 : i32
    %2 = arith.cmpi ne, %1, %c0_i32_0 : i32
    scf.if %2 {
      %cst_10 = arith.constant 0.000000e+00 : f32
      %12 = vector.broadcast %cst_10 : f32 to vector<128x128xf32>
      %c0_11 = arith.constant 0 : index
      %c0_12 = arith.constant 0 : index
      %13 = vector.load %arg7[%c0_11, %c0_12] : memref<128x128xf32, #tpu.memory_space<vmem>>, vector<128x128xf32>
      tpu.vector_store %arg7[%c0_11, %c0_12], %12 {strides = array<i32>} : memref<128x128xf32, #tpu.memory_space<vmem>>, vector<128x128xf32>,
    } else {
    }
    %c0 = arith.constant 0 : index
    %c0_1 = arith.constant 0 : index
    %3 = vector.load %arg7[%c0, %c0_1] : memref<128x128xf32, #tpu.memory_space<vmem>>, vector<128x128xf32>
    %c0_2 = arith.constant 0 : index
    %c0_3 = arith.constant 0 : index
    %4 = vector.load %arg2[%c0_2, %c0_3] : memref<128x128xbf16, #tpu.memory_space<vmem>>, vector<128x128xbf16>
    %c0_4 = arith.constant 0 : index
    %c0_5 = arith.constant 0 : index
    %5 = vector.load %arg3[%c0_4, %c0_5] : memref<128x128xbf16, #tpu.memory_space<vmem>>, vector<128x128xbf16>
    %cst = arith.constant dense<0.000000e+00> : vector<128x128xf32>
    %6 = tpu.matmul %4, %5, %cst {dimension_numbers = #tpu.dot_dimension_numbers<[1], [0], [0], [1], [0, 0, 1, 1], [], []>} : vector<128x128xbf16>, vector<128x128xbf16>, vector<128x128xf32> -> vector<128x128xf32>
    %7 = arith.addf %3, %6 : vector<128x128xf32>
    %c0_6 = arith.constant 0 : index
    %c0_7 = arith.constant 0 : index
    %8 = vector.load %arg7[%c0_6, %c0_7] : memref<128x128xf32, #tpu.memory_space<vmem>>, vector<128x128xf32>
    tpu.vector_store %arg7[%c0_6, %c0_7], %7 {strides = array<i32>} : memref<128x128xf32, #tpu.memory_space<vmem>>, vector<128x128xf32>,
    %c0_i32_8 = arith.constant 0 : i32
    %9 = arith.cmpi eq, %arg1, %c0_i32_8 : i32
    %10 = arith.extui %9 : i1 to i32
    %c0_i32_9 = arith.constant 0 : i32
    %11 = arith.cmpi ne, %10, %c0_i32_9 : i32
    scf.if %11 {
      %c0_10 = arith.constant 0 : index
      %c0_11 = arith.constant 0 : index
      %12 = vector.load %arg7[%c0_10, %c0_11] : memref<128x128xf32, #tpu.memory_space<vmem>>, vector<128x128xf32>
      %13 = arith.truncf %12 : vector<128x128xf32> to vector<128x128xbf16>
      %c0_12 = arith.constant 0 : index
      %c0_13 = arith.constant 0 : index
      %14 = vector.load %arg4[%c0_12, %c0_13] : memref<128x128xbf16, #tpu.memory_space<vmem>>, vector<128x128xbf16>
      %cst_14 = arith.constant dense<0.000000e+00> : vector<128x128xf32>
      %15 = tpu.matmul %13, %14, %cst_14 {dimension_numbers = #tpu.dot_dimension_numbers<[1], [0], [0], [1], [0, 0, 1, 1], [], []>} : vector<128x128xbf16>, vector<128x128xbf16>, vector<128x128xf32> -> vector<128x128xf32>
      %c0_15 = arith.constant 0 : index
      %c0_16 = arith.constant 0 : index
      %16 = vector.load %arg5[%c0_15, %c0_16] : memref<1x128xf32, #tpu.memory_space<vmem>>, vector<1x128xf32>
      %17 = vector.broadcast %16 : vector<1x128xf32> to vector<128x128xf32>
      %18 = arith.addf %15, %17 : vector<128x128xf32>
      %c0_17 = arith.constant 0 : index
      %c0_18 = arith.constant 0 : index
      %19 = vector.load %arg6[%c0_17, %c0_18] : memref<128x128xf32, #tpu.memory_space<vmem>>, vector<128x128xf32>
      tpu.vector_store %arg6[%c0_17, %c0_18], %18 {strides = array<i32>} : memref<128x128xf32, #tpu.memory_space<vmem>>, vector<128x128xf32>,
    } else {
    }
    return
  }
  func.func @transform_0(%arg0: i32, %arg1: i32) -> (i32, i32) {
    %c0_i32 = arith.constant 0 : i32
    return %arg0, %arg1 : i32, i32
  }
  func.func @transform_1(%arg0: i32, %arg1: i32) -> (i32, i32) {
    %c0_i32 = arith.constant 0 : i32
    %c0_i32_0 = arith.constant 0 : i32
    return %arg1, %c0_i32 : i32, i32
  }
  func.func @transform_2(%arg0: i32, %arg1: i32) -> (i32, i32) {
    %c0_i32 = arith.constant 0 : i32
    %c0_i32_0 = arith.constant 0 : i32
    %c0_i32_1 = arith.constant 0 : i32
    return %c0_i32, %c0_i32_0 : i32, i32
  }
  func.func @transform_3(%arg0: i32, %arg1: i32) -> (i32, i32) {
    %c0_i32 = arith.constant 0 : i32
    %c0_i32_0 = arith.constant 0 : i32
    %c0_i32_1 = arith.constant 0 : i32
    return %c0_i32, %c0_i32_0 : i32, i32
  }
  func.func @transform_4(%arg0: i32, %arg1: i32) -> (i32, i32) {
    %c0_i32 = arith.constant 0 : i32
    %c0_i32_0 = arith.constant 0 : i32
    return %arg0, %c0_i32 : i32, i32
  }
}

</mosaic_0001>

<bundles_post_ra>
// kernel: tpu_custom_call.1
= control target key start
LH: loop header
LB: loop body
LE: loop exit
PB: predicated region body
PF: predicated region fallthrough
CT: control target
= control target key end

     0   :  { %9 = vsyncpa [#allocation4], 0  ;;  %s869_s0 = inlined_call_operand.hbm [shape: bf16[128,128], index: 0, kind: input, shape index: {}]   ;;  %s870_s1 = inlined_call_operand.hbm [shape: bf16[128,128], index: 1, kind: input, shape index: {}]   ;;  %s871_s2 = inlined_call_operand.hbm [shape: bf16[128,128], index: 2, kind: input, shape index: {}]   ;;  %s872_s3 = inlined_call_operand.vmem [shape: f32[1,128], index: 3, kind: input, shape index: {}]   ;;  %s873_s4 = inlined_call_operand.hbm [shape: f32[128,128], index: 4, kind: output, shape index: {}]  }
   0x1   :  { %10 = vsyncpa [#allocation7], 0 }
   0x2   :  { %11 = vsyncpa [#allocation5], 0  ;;  %s821_s15 = smov [#allocation6]   ;;  %s822_s17 = smov [#allocation3]  }
   0x3   :  { %s29_s16 = sshll.u32 %s821_s15, 4  ;;  %s17_s18 = sshll.u32 %s822_s17, 4  ;;  %s30_s16 = int_to_ptr.vmem [resolvable:$true] %s29_s16  ;;  %s18_s18 = int_to_ptr.vmem [resolvable:$true] %s17_s18 }
   0x4   :  { %s743_s19 = scalar_lea.vmem %s30_s16, 1024  ;;  %p748_p1 = scmp.lt.s32.totalorder %s30_s16, %s30_s16 }
   0x5   :  { %p744_p0 = scmp.ne.s32.totalorder %s30_s16, %s743_s19  ;;  %p749_p2 = scmp.lt.s32.totalorder %s743_s19, %s743_s19 }
   0x7   :  { %p750_p3 = por %p749_p2, %p748_p1 }
   0x9   :  { %p751_p4 = pnand %p750_p3, %p744_p0 }
   0xb   :  { %754 = shalt.err (!%p751_p4)
}
   0xc   :  { %s823_s20 = smov 64   ;;  %s824_s21 = smov 4  }
   0xd   :  { %35 = dma.hbm_to_vmem [thread:$0]  %s870_s1, 1024, %s30_s16, [#allocation7], %s823_s20, %s823_s20, %s824_s21  }
   0xe   :  { %s763_s24 = scalar_lea.vmem %s18_s18, 1024  ;;  %p768_p6 = scmp.lt.s32.totalorder %s18_s18, %s18_s18 }
   0xf   :  { %p764_p5 = scmp.ne.s32.totalorder %s18_s18, %s763_s24  ;;  %p769_p7 = scmp.lt.s32.totalorder %s763_s24, %s763_s24 }
  0x11   :  { %p770_p8 = por %p769_p7, %p768_p6 }
  0x13   :  { %p771_p9 = pnand %p770_p8, %p764_p5 }
  0x15   :  { %774 = shalt.err (!%p771_p9)
}
  0x16   :  { %23 = dma.hbm_to_vmem [thread:$0]  %s869_s0, 1024, %s18_s18, [#allocation4], %s823_s20, %s823_s20, %s824_s21  }
  0x17   :  { %s825_s27 = smov [#allocation8]  }
  0x18   :  { %s41_s28 = sshll.u32 %s825_s27, 4  ;;  %s42_s28 = int_to_ptr.vmem [resolvable:$true] %s41_s28 }
  0x19   :  { %s783_s29 = scalar_lea.vmem %s42_s28, 1024  ;;  %p788_p11 = scmp.lt.s32.totalorder %s42_s28, %s42_s28 }
  0x1a   :  { %p784_p10 = scmp.ne.s32.totalorder %s42_s28, %s783_s29  ;;  %p789_p12 = scmp.lt.s32.totalorder %s783_s29, %s783_s29 }
  0x1c   :  { %p790_p13 = por %p789_p12, %p788_p11 }
  0x1e   :  { %p791_p0 = pnand %p790_p13, %p784_p10 }
  0x20   :  { %794 = shalt.err (!%p791_p0)
}
  0x21   :  { %47 = dma.hbm_to_vmem [thread:$0]  %s871_s2, 1024, %s42_s28, [#allocation7], %s823_s20, %s823_s20, %s824_s21  }
  0x22   :  { %815 = dma.done.wait [#allocation4], 1024  }
  0x23   :  { %816 = vsyncadd [#allocation4], 4294966272 }
  0x24   :  { %817 = dma.done.wait [#allocation7], 2048  }
  0x25   :  { %818 = vsyncadd [#allocation7], 4294965248  ;;  %v711_v0 = vld [vmem:[#allocation6 + $0x38] sm:$0xff]   ;;  %v712_v1 = vld [vmem:[#allocation6 + $0x30] sm:$0xff]  }
  0x26   :  { %639 = vmatprep.subr.bf16.mxu0 %v711_v0  ;;  %v713_v2 = vld [vmem:[#allocation6 + $0x28] sm:$0xff]   ;;  %v714_v3 = vld [vmem:[#allocation6 + $0x20] sm:$0xff]   ;;  %v715_v5 = vld [vmem:[#allocation6 + $0x18] sm:$0xff]  }
  0x27   :  { %640 = vmatpush3.bf16.msra.mxu0 %v711_v0  ;;  %v719_v4 = vld [vmem:[#allocation3] sm:$0xff]   ;;  %v716_v6 = vld [vmem:[#allocation6 + $0x10] sm:$0xff]   ;;  %v727_v7 = vld [vmem:[#allocation8 + $0x38] sm:$0xff]  }
  0x28   :  { %641 = vmatprep.subr.bf16.mxu0 %v712_v1  ;;  %655 = vmatprep.mubr.bf16.mxu0 %v719_v4  ;;  %v728_v8 = vld [vmem:[#allocation8 + $0x30] sm:$0xff]   ;;  %v717_v9 = vld [vmem:[#allocation6 + $0x8] sm:$0xff]   ;;  %v718_v11 = vld [vmem:[#allocation6] sm:$0xff]  }
  0x29   :  { %671 = vmatprep.subr.bf16.mxu1 %v727_v7  ;;  %v729_v10 = vld [vmem:[#allocation8 + $0x28] sm:$0xff]   ;;  %v730_v12 = vld [vmem:[#allocation8 + $0x20] sm:$0xff]   ;;  %v731_v13 = vld [vmem:[#allocation8 + $0x18] sm:$0xff]  }
  0x2a   :  { %672 = vmatpush3.bf16.msra.mxu1 %v727_v7  ;;  %v720_v14 = vld [vmem:[#allocation3 + $0x8] sm:$0xff]   ;;  %v721_v15 = vld [vmem:[#allocation3 + $0x10] sm:$0xff]   ;;  %v722_v17 = vld [vmem:[#allocation3 + $0x18] sm:$0xff]  }
  0x2b   :  { %642 = vmatpush3.bf16.msra.mxu0 %v712_v1  ;;  %673 = vmatprep.subr.bf16.mxu1 %v728_v8  ;;  %v732_v16 = vld [vmem:[#allocation8 + $0x10] sm:$0xff]   ;;  %v723_v18 = vld [vmem:[#allocation3 + $0x20] sm:$0xff]   ;;  %v724_v19 = vld [vmem:[#allocation3 + $0x28] sm:$0xff]  }
  0x2c   :  { %643 = vmatprep.subr.bf16.mxu0 %v713_v2  ;;  %v725_v20 = vld [vmem:[#allocation3 + $0x30] sm:$0xff]   ;;  %v726_v21 = vld [vmem:[#allocation3 + $0x38] sm:$0xff]   ;;  %v733_v22 = vld [vmem:[#allocation8 + $0x8] sm:$0xff]  }
  0x2d   :  { %v734_v23 = vld [vmem:[#allocation8] sm:$0xff]  }
  0x2e   :  { %674 = vmatpush3.bf16.msra.mxu1 %v728_v8  ;;  %v598_v48 = vld [vmem:[%s872_s3] ss:$0 sm:$0xff]  ;;  %s826_s3 = smov [#allocation9]  }
  0x2f   :  { %644 = vmatpush3.bf16.msra.mxu0 %v713_v2  ;;  %675 = vmatprep.subr.bf16.mxu1 %v729_v10  ;;  %s569_s5 = sshll.u32 %s826_s3, 4  ;;  %s570_s5 = int_to_ptr.vmem [resolvable:$true] %s569_s5 }
  0x30   :  { %645 = vmatprep.subr.bf16.mxu0 %v714_v3  ;;  %s795_s6 = scalar_lea.vmem %s570_s5, 2048  ;;  %p800_p2 = scmp.lt.s32.totalorder %s570_s5, %s570_s5 }
  0x31   :  { %p796_p1 = scmp.ne.s32.totalorder %s570_s5, %s795_s6  ;;  %p801_p3 = scmp.lt.s32.totalorder %s795_s6, %s795_s6 }
  0x32   :  { %676 = vmatpush3.bf16.msra.mxu1 %v729_v10 }
  0x33   :  { %646 = vmatpush3.bf16.msra.mxu0 %v714_v3  ;;  %677 = vmatprep.subr.bf16.mxu1 %v730_v12  ;;  %p802_p4 = por %p801_p3, %p800_p2 }
  0x34   :  { %647 = vmatprep.subr.bf16.mxu0 %v715_v5 }
  0x35   :  { %p803_p5 = pnand %p802_p4, %p796_p1 }
  0x36   :  { %678 = vmatpush3.bf16.msra.mxu1 %v730_v12 }
  0x37   :  { %648 = vmatpush3.bf16.msra.mxu0 %v715_v5  ;;  %679 = vmatprep.subr.bf16.mxu1 %v731_v13 }
  0x38   :  { %649 = vmatprep.subr.bf16.mxu0 %v716_v6 }
  0x3a   :  { %680 = vmatpush3.bf16.msra.mxu1 %v731_v13 }
  0x3b   :  { %650 = vmatpush3.bf16.msra.mxu0 %v716_v6  ;;  %681 = vmatprep.subr.bf16.mxu1 %v732_v16 }
  0x3c   :  { %651 = vmatprep.subr.bf16.mxu0 %v717_v9 }
  0x3e   :  { %682 = vmatpush3.bf16.msra.mxu1 %v732_v16 }
  0x3f   :  { %652 = vmatpush3.bf16.msra.mxu0 %v717_v9  ;;  %683 = vmatprep.subr.bf16.mxu1 %v733_v22 }
  0x40   :  { %653 = vmatprep.subr.bf16.mxu0 %v718_v11 }
  0x42   :  { %684 = vmatpush3.bf16.msra.mxu1 %v733_v22 }
  0x43   :  { %654 = vmatpush3.bf16.msra.mxu0 %v718_v11  ;;  %685 = vmatprep.subr.bf16.mxu1 %v734_v23 }
  0x46   :  { %656 = vmatmul.mubr.bf16.vlgmr.msra.gmra.mxu0 %v720_v14  ;;  %686 = vmatpush3.bf16.msra.mxu1 %v734_v23 }
  0x47   :  { %659 = vmatprep.mubr.bf16.mxu0 %v721_v15 }
  0x4e   :  { %660 = vmatmul.mubr.bf16.gmra.mxu0 %v722_v17 }
  0x4f   :  { %663 = vmatprep.mubr.bf16.mxu0 %v723_v18 }
  0x56   :  { %664 = vmatmul.mubr.bf16.gmra.mxu0 %v724_v19 }
  0x57   :  { %667 = vmatprep.mubr.bf16.mxu0 %v725_v20 }
  0x5e   :  { %668 = vmatmul.mubr.bf16.gmra.mxu0 %v726_v21 }
 0x106   :  { %v657_v24 = vpop.f32.mrf.mxu0 }
 0x108   :  { %v258_v25 = vpop.f32.mrf.mxu0 }
 0x10a   :  { %v658_v26 = vpop.f32.mrf.mxu0 }
 0x10b   :  { %v373_v29 = vpack.c.bf16 %v658_v26, %v657_v24 }
 0x10c   :  { %v261_v27 = vpop.f32.mrf.mxu0 }
 0x10d   :  { %v372_v28 = vpack.c.bf16 %v261_v27, %v258_v25 }
 0x10e   :  { %v661_v30 = vpop.f32.mrf.mxu0 }
 0x10f   :  { %687 = vmatprep.mubr.bf16.mxu1 %v372_v28 }
 0x110   :  { %v274_v31 = vpop.f32.mrf.mxu0  ;;  %688 = vmatmul.mubr.bf16.vlgmr.msra.gmra.mxu1 %v373_v29 }
 0x112   :  { %v662_v32 = vpop.f32.mrf.mxu0 }
 0x113   :  { %v375_v35 = vpack.c.bf16 %v662_v32, %v661_v30 }
 0x114   :  { %v277_v33 = vpop.f32.mrf.mxu0 }
 0x115   :  { %v374_v34 = vpack.c.bf16 %v277_v33, %v274_v31 }
 0x116   :  { %v665_v36 = vpop.f32.mrf.mxu0 }
 0x117   :  { %691 = vmatprep.mubr.bf16.mxu1 %v374_v34 }
 0x118   :  { %v290_v37 = vpop.f32.mrf.mxu0  ;;  %692 = vmatmul.mubr.bf16.gmra.mxu1 %v375_v35 }
 0x11a   :  { %v666_v38 = vpop.f32.mrf.mxu0 }
 0x11b   :  { %v377_v41 = vpack.c.bf16 %v666_v38, %v665_v36 }
 0x11c   :  { %v293_v39 = vpop.f32.mrf.mxu0 }
 0x11d   :  { %v376_v40 = vpack.c.bf16 %v293_v39, %v290_v37 }
 0x11e   :  { %v669_v42 = vpop.f32.mrf.mxu0 }
 0x11f   :  { %695 = vmatprep.mubr.bf16.mxu1 %v376_v40 }
 0x120   :  { %v306_v43 = vpop.f32.mrf.mxu0  ;;  %696 = vmatmul.mubr.bf16.gmra.mxu1 %v377_v41 }
 0x122   :  { %v670_v44 = vpop.f32.mrf.mxu0 }
 0x123   :  { %v379_v47 = vpack.c.bf16 %v670_v44, %v669_v42 }
 0x124   :  { %v309_v45 = vpop.f32.mrf.mxu0 }
 0x125   :  { %v378_v46 = vpack.c.bf16 %v309_v45, %v306_v43 }
 0x127   :  { %699 = vmatprep.mubr.bf16.mxu1 %v378_v46 }
 0x128   :  { %700 = vmatmul.mubr.bf16.gmra.mxu1 %v379_v47 }
 0x1d0   :  { %v689_v49 = vpop.f32.mrf.mxu1 }
 0x1d1   :  { %v494_v50 = vadd.f32 %v689_v49, %v598_v48 }
 0x1d2   :  { %v485_v51 = vpop.f32.mrf.mxu1 }
 0x1d3   :  { %550 = vst [vmem:[#allocation9 + $0x10] sm:$0xff] %v494_v50  ;;  %v486_v52 = vadd.f32 %v598_v48, %v485_v51 }
 0x1d4   :  { %v690_v53 = vpop.f32.mrf.mxu1 }
 0x1d5   :  { %548 = vst [vmem:[#allocation9] sm:$0xff] %v486_v52  ;;  %v497_v54 = vadd.f32 %v690_v53, %v598_v48 }
 0x1d6   :  { %v488_v55 = vpop.f32.mrf.mxu1 }
 0x1d7   :  { %551 = vst [vmem:[#allocation9 + $0x18] sm:$0xff] %v497_v54  ;;  %v489_v56 = vadd.f32 %v598_v48, %v488_v55 }
 0x1d8   :  { %v693_v57 = vpop.f32.mrf.mxu1 }
 0x1d9   :  { %549 = vst [vmem:[#allocation9 + $0x8] sm:$0xff] %v489_v56  ;;  %v510_v58 = vadd.f32 %v693_v57, %v598_v48 }
 0x1da   :  { %v501_v59 = vpop.f32.mrf.mxu1 }
 0x1db   :  { %554 = vst [vmem:[#allocation9 + $0x30] sm:$0xff] %v510_v58  ;;  %v502_v60 = vadd.f32 %v598_v48, %v501_v59 }
 0x1dc   :  { %v694_v61 = vpop.f32.mrf.mxu1 }
 0x1dd   :  { %552 = vst [vmem:[#allocation9 + $0x20] sm:$0xff] %v502_v60  ;;  %v513_v62 = vadd.f32 %v694_v61, %v598_v48 }
 0x1de   :  { %v504_v63 = vpop.f32.mrf.mxu1 }
 0x1df   :  { %555 = vst [vmem:[#allocation9 + $0x38] sm:$0xff] %v513_v62  ;;  %v505_v0 = vadd.f32 %v598_v48, %v504_v63 }
 0x1e0   :  { %v697_v1 = vpop.f32.mrf.mxu1 }
 0x1e1   :  { %553 = vst [vmem:[#allocation9 + $0x28] sm:$0xff] %v505_v0  ;;  %v526_v2 = vadd.f32 %v697_v1, %v598_v48 }
 0x1e2   :  { %v517_v3 = vpop.f32.mrf.mxu1 }
 0x1e3   :  { %558 = vst [vmem:[#allocation9 + $0x50] sm:$0xff] %v526_v2  ;;  %v518_v4 = vadd.f32 %v598_v48, %v517_v3 }
 0x1e4   :  { %v698_v5 = vpop.f32.mrf.mxu1 }
 0x1e5   :  { %556 = vst [vmem:[#allocation9 + $0x40] sm:$0xff] %v518_v4  ;;  %v529_v6 = vadd.f32 %v698_v5, %v598_v48 }
 0x1e6   :  { %v520_v7 = vpop.f32.mrf.mxu1 }
 0x1e7   :  { %559 = vst [vmem:[#allocation9 + $0x58] sm:$0xff] %v529_v6  ;;  %v521_v8 = vadd.f32 %v598_v48, %v520_v7 }
 0x1e8   :  { %v701_v9 = vpop.f32.mrf.mxu1 }
 0x1e9   :  { %557 = vst [vmem:[#allocation9 + $0x48] sm:$0xff] %v521_v8  ;;  %v542_v10 = vadd.f32 %v701_v9, %v598_v48 }
 0x1ea   :  { %v533_v11 = vpop.f32.mrf.mxu1 }
 0x1eb   :  { %562 = vst [vmem:[#allocation9 + $0x70] sm:$0xff] %v542_v10  ;;  %v534_v12 = vadd.f32 %v598_v48, %v533_v11 }
 0x1ec   :  { %v702_v13 = vpop.f32.mrf.mxu1 }
 0x1ed   :  { %560 = vst [vmem:[#allocation9 + $0x60] sm:$0xff] %v534_v12  ;;  %v545_v14 = vadd.f32 %v702_v13, %v598_v48 }
 0x1ee   :  { %v536_v15 = vpop.f32.mrf.mxu1 }
 0x1ef   :  { %563 = vst [vmem:[#allocation9 + $0x78] sm:$0xff] %v545_v14  ;;  %v537_v16 = vadd.f32 %v598_v48, %v536_v15 }
 0x1f1   :  { %561 = vst [vmem:[#allocation9 + $0x68] sm:$0xff] %v537_v16 }
 0x1f2   :  { %806 = shalt.err (!%p803_p5)
}
 0x1f3   :  { %s827_s7 = smov 128   ;;  %s828_s8 = smov 8  }
 0x1f4   :  { %575 = dma.vmem_to_hbm [thread:$0]  %s570_s5, 2048, %s873_s4, [#allocation5], %s827_s7, %s827_s7, %s828_s8  }
 0x1f5   :  { %819 = dma.done.wait [#allocation5], 2048  }
 0x1f6   :  { %820 = vsyncadd [#allocation5], 4294965248 }
 0x1f7   :  { %579 = vsyncpa [#allocation4], 1 }
 0x1f8   :  { %580 = vsyncpa [#allocation7], 1 }
 0x1f9   :  { %581 = vsyncpa [#allocation5], 1 }

</bundles_post_ra>
